<compile_context>
chip_gen: v7x
topology: tpu7x:2x2x1
jax: 0.10.0
libtpu: 0.0.40
codegen_flags: <defaults>
</compile_context>

<pallas_src>
import functools

import jax
import jax.numpy as jnp
import numpy as np
from jax import lax
from jax.experimental import pallas as pl
from jax.experimental.pallas import tpu as pltpu

BETA = 1.0e8
HIDDEN = 60
IN_FEATS = 2
OUT_FEATS = 5
PAD = 128            # lane-padded width for the hidden layers
DEFAULT_TM = 1024    # batch-row tile (tunable; multiple of 16)


def _round_up(v, m):
    return ((v + m - 1) // m) * m


def pinn_kernel(x_ref,
                w1_ref, b1_ref, w2_ref, b2_ref, w3_ref, b3_ref,
                w4_ref, b4_ref, w5_ref, b5_ref, w6_ref, b6_ref,
                o_ref):
    tm = x_ref.shape[0]
    half = tm // 2   # tm is always a multiple of 16, so half is sublane-aligned

    hidden = ((w2_ref, b2_ref), (w3_ref, b3_ref),
              (w4_ref, b4_ref), (w5_ref, b5_ref))

    def half_chain(r0, r1):
        # Layer 1 on the VPU (input has only 2 features; an MXU matmul would
        # be ~98% zero work). All elementwise math stays f32.
        xh = x_ref[r0:r1, :]
        h = (xh[:, 0:1] * w1_ref[0:1, :]
             + xh[:, 1:2] * w1_ref[1:2, :]
             + b1_ref[...])
        h = h + h * h            # poly; its 1/10 is folded into the next weights
        # Hidden layers 2-5: bf16 MXU matmuls with f32 accumulation.
        for (w_ref, b_ref) in hidden:
            h = jnp.dot(h.astype(w_ref.dtype), w_ref[...],
                        precision=lax.Precision.DEFAULT,
                        preferred_element_type=jnp.float32) + b_ref[...]
            h = h + h * h
        # Output layer: 1/10 (poly) and 1/BETA (cols 0,1) already folded in.
        h = jnp.dot(h.astype(w6_ref.dtype), w6_ref[...],
                    precision=lax.Precision.DEFAULT,
                    preferred_element_type=jnp.float32) + b6_ref[...]
        return h[:, :OUT_FEATS]

    # Two independent dependency chains -> MXU/VPU overlap within the tile.
    out_a = half_chain(0, half)
    out_b = half_chain(half, tm)
    o_ref[0:half, :] = out_a
    o_ref[half:tm, :] = out_b


def _pad2(a, rows, cols, dtype=jnp.float32):
    out = jnp.zeros((rows, cols), dtype=jnp.float32)
    out = out.at[: a.shape[0], : a.shape[1]].set(a.astype(jnp.float32))
    return out.astype(dtype)


def prepare_params(params, weight_dtype=jnp.bfloat16):
    """One-time preparation: pad weights/biases to lane width 128, fold the
    polynomial's 1/10 into the downstream weights (w2..w6), fold the 1/BETA
    scaling of output columns 0,1 into the last layer, and cast the MXU
    weights (w2..w6) to `weight_dtype` (bf16 by default; pass jnp.float32 for
    an f32 validation mode). Call once per weight update."""
    (w1, b1), (w2, b2), (w3, b3), (w4, b4), (w5, b5), (w6, b6) = params

    act_scale = jnp.float32(0.1)                 # (x + x^2) / 10 -> fold the /10
    w2f = w2 * act_scale
    w3f = w3 * act_scale
    w4f = w4 * act_scale
    w5f = w5 * act_scale

    col_scale = jnp.ones((OUT_FEATS,), dtype=jnp.float32)
    col_scale = col_scale.at[0].set(1.0 / BETA).at[1].set(1.0 / BETA)
    w6f = (w6 * act_scale) * col_scale[None, :]
    b6f = b6 * col_scale

    prepared = (
        _pad2(w1, IN_FEATS, PAD),                      # f32: VPU layer
        _pad2(b1[None, :], 1, PAD),
        _pad2(w2f, PAD, PAD, weight_dtype), _pad2(b2[None, :], 1, PAD),
        _pad2(w3f, PAD, PAD, weight_dtype), _pad2(b3[None, :], 1, PAD),
        _pad2(w4f, PAD, PAD, weight_dtype), _pad2(b4[None, :], 1, PAD),
        _pad2(w5f, PAD, PAD, weight_dtype), _pad2(b5[None, :], 1, PAD),
        _pad2(w6f, PAD, PAD, weight_dtype), _pad2(b6f[None, :], 1, PAD),
    )
    return tuple(jax.device_put(p) for p in prepared)


@functools.partial(jax.jit, static_argnames=("tm",))
def pinn_forward(x, prepared, tm=DEFAULT_TM):
    """x: (N, 2) float32, prepared = prepare_params(params) -> (N, 5) float32."""
    n = x.shape[0]
    # Clamp the row tile: multiple of 16 (two sublane-aligned halves), and at
    # least 2 grid steps when there is enough work so both v7x TensorCores are
    # busy (per-step overhead ~0.35us is negligible on single-TC v5e/v6e).
    tm = min(int(tm), _round_up(-(-n // 2), 16))
    tm = max(16, _round_up(tm, 16))
    n_pad = _round_up(n, tm)

    x = x.astype(jnp.float32)
    if n_pad != n:
        x = jnp.zeros((n_pad, IN_FEATS), dtype=jnp.float32).at[:n, :].set(x)

    grid = (n_pad // tm,)

    x_spec = pl.BlockSpec((tm, IN_FEATS), lambda i: (i, 0))
    w1_spec = pl.BlockSpec((IN_FEATS, PAD), lambda i: (0, 0))
    w_spec = pl.BlockSpec((PAD, PAD), lambda i: (0, 0))
    b_spec = pl.BlockSpec((1, PAD), lambda i: (0, 0))
    out_spec = pl.BlockSpec((tm, OUT_FEATS), lambda i: (i, 0))

    # Advisory cost: 5 MXU matmuls per tile + VPU layer-1/activations;
    # bytes = x in + narrow out + weights (read once).
    weight_bytes = sum(int(p.size) * p.dtype.itemsize for p in prepared)
    cost = pl.CostEstimate(
        flops=grid[0] * (2 * 5 * tm * PAD * PAD + 12 * tm * PAD),
        transcendentals=0,
        bytes_accessed=(n_pad * IN_FEATS * 4 + n_pad * OUT_FEATS * 4
                        + weight_bytes),
    )

    out = pl.pallas_call(
        pinn_kernel,
        out_shape=jax.ShapeDtypeStruct((n_pad, OUT_FEATS), jnp.float32),
        grid_spec=pltpu.PrefetchScalarGridSpec(
            num_scalar_prefetch=0,
            grid=grid,
            in_specs=[x_spec,
                      w1_spec, b_spec, w_spec, b_spec, w_spec, b_spec,
                      w_spec, b_spec, w_spec, b_spec, w_spec, b_spec],
            out_specs=out_spec,
        ),
        compiler_params=pltpu.CompilerParams(
            dimension_semantics=("parallel",)),
        cost_estimate=cost,
    )(x, *prepared)

    return out if n_pad == n else out[:n]


def init_params(key):
    """Deterministic xavier-normal weights, zero biases, matching nn.Linear
    shapes; stored as (in, out) so the forward computes x @ W + b."""
    dims = [(IN_FEATS, HIDDEN), (HIDDEN, HIDDEN), (HIDDEN, HIDDEN),
            (HIDDEN, HIDDEN), (HIDDEN, HIDDEN), (HIDDEN, OUT_FEATS)]
    params = []
    for (fan_in, fan_out) in dims:
        key, sub = jax.random.split(key)
        std = float(np.sqrt(2.0 / (fan_in + fan_out)))
        w = jax.random.normal(sub, (fan_in, fan_out), dtype=jnp.float32) * std
        b = jnp.zeros((fan_out,), dtype=jnp.float32)
        params.append((w, b))
    return params


def pinn_forward_ref(x, params):
    """Pure-JAX f32 reference of PINN.forward (module semantics)."""
    h = x.astype(jnp.float32)
    for (w, b) in params[:-1]:
        z = jnp.dot(h, w, precision=lax.Precision.HIGHEST) + b
        h = (z + z * z) / 10.0
    w, b = params[-1]
    h = jnp.dot(h, w, precision=lax.Precision.HIGHEST) + b
    h = h.at[:, 0].set(h[:, 0] / BETA)
    h = h.at[:, 1].set(h[:, 1] / BETA)
    return h


def pinn_forward_prepared_ref(x, prepared):
    """Precision-matched reference: same folded/padded/bf16 weights as the
    kernel, plain jnp ops. Used for the tight numerical check."""
    (w1, b1, w2, b2, w3, b3, w4, b4, w5, b5, w6, b6) = prepared
    x = x.astype(jnp.float32)
    h = x[:, 0:1] * w1[0:1, :] + x[:, 1:2] * w1[1:2, :] + b1
    h = h + h * h
    for (w, b) in ((w2, b2), (w3, b3), (w4, b4), (w5, b5)):
        h = jnp.dot(h.astype(w.dtype), w, precision=lax.Precision.DEFAULT,
                    preferred_element_type=jnp.float32) + b
        h = h + h * h
    h = jnp.dot(h.astype(w6.dtype), w6, precision=lax.Precision.DEFAULT,
                preferred_element_type=jnp.float32) + b6
    return h[:, :OUT_FEATS]


if __name__ == "__main__":
    key = jax.random.PRNGKey(0)
    kp, kx = jax.random.split(key)
    params = init_params(kp)
    prepared = prepare_params(params)   # one-time padding / 0.1 + 1/BETA folds, bf16 cast

    # Small input consistent with the module: (N, 2) coordinate points.
    # N = 100 is not a multiple of the row tile, so the pad/trim path and the
    # >=2-grid-step clamp are exercised too.
    N = 100
    x = jax.random.uniform(kx, (N, IN_FEATS), dtype=jnp.float32,
                           minval=-10.0, maxval=10.0)

    out = pinn_forward(x, prepared)
    out = jax.block_until_ready(out)
    assert out.shape == (N, OUT_FEATS)

    # 1) Tight check against a precision-matched (same folded bf16 weights)
    #    pure-JAX reference: validates the kernel's math end to end.
    ref_matched = np.asarray(pinn_forward_prepared_ref(x, prepared))
    np.testing.assert_allclose(np.asarray(out), ref_matched,
                               rtol=1e-4, atol=1e-9)

    # 2) Structural/semantic check against the f32 module reference with a
    #    tolerance that accommodates bf16 matmul rounding but still catches
    #    any wrong fold / scaling / column mix-up (per-column relative L2).
    ref_f32 = np.asarray(pinn_forward_ref(x, params))
    err = np.asarray(out) - ref_f32
    for c in range(OUT_FEATS):
        denom = np.linalg.norm(ref_f32[:, c]) + 1e-30
        rel = np.linalg.norm(err[:, c]) / denom
        assert rel < 0.1, f"column {c}: relative L2 error {rel:.3e}"

    print("KERNEL_OK")
</pallas_src>

<mosaic_0001>
module attributes {stable_mosaic.version = 11 : i64} {
  func.func @pinn_kernel(%arg0: i32, %arg1: memref<64x2xf32, #tpu.memory_space<vmem>>, %arg2: memref<2x128xf32, #tpu.memory_space<vmem>>, %arg3: memref<1x128xf32, #tpu.memory_space<vmem>>, %arg4: memref<128x128xbf16, #tpu.memory_space<vmem>>, %arg5: memref<1x128xf32, #tpu.memory_space<vmem>>, %arg6: memref<128x128xbf16, #tpu.memory_space<vmem>>, %arg7: memref<1x128xf32, #tpu.memory_space<vmem>>, %arg8: memref<128x128xbf16, #tpu.memory_space<vmem>>, %arg9: memref<1x128xf32, #tpu.memory_space<vmem>>, %arg10: memref<128x128xbf16, #tpu.memory_space<vmem>>, %arg11: memref<1x128xf32, #tpu.memory_space<vmem>>, %arg12: memref<128x128xbf16, #tpu.memory_space<vmem>>, %arg13: memref<1x128xf32, #tpu.memory_space<vmem>>, %arg14: memref<64x5xf32, #tpu.memory_space<vmem>>) attributes {dimension_semantics = [#tpu.dimension_semantics<parallel>], iteration_bounds = array<i64: 2>, scalar_prefetch = 0 : i64, scratch_operands = 0 : i64, tpu.core_type = #tpu.core_type<tc>, window_params = [{transform_indices = @transform_0, window_bounds = array<i64: 64, 2>}, {pipeline_mode = #tpu.pipeline_mode<synchronous>, transform_indices = @transform_1, window_bounds = array<i64: 2, 128>}, {pipeline_mode = #tpu.pipeline_mode<synchronous>, transform_indices = @transform_2, window_bounds = array<i64: 1, 128>}, {pipeline_mode = #tpu.pipeline_mode<synchronous>, transform_indices = @transform_3, window_bounds = array<i64: 128, 128>}, {pipeline_mode = #tpu.pipeline_mode<synchronous>, transform_indices = @transform_4, window_bounds = array<i64: 1, 128>}, {pipeline_mode = #tpu.pipeline_mode<synchronous>, transform_indices = @transform_5, window_bounds = array<i64: 128, 128>}, {pipeline_mode = #tpu.pipeline_mode<synchronous>, transform_indices = @transform_6, window_bounds = array<i64: 1, 128>}, {pipeline_mode = #tpu.pipeline_mode<synchronous>, transform_indices = @transform_7, window_bounds = array<i64: 128, 128>}, {pipeline_mode = #tpu.pipeline_mode<synchronous>, transform_indices = @transform_8, window_bounds = array<i64: 1, 128>}, {pipeline_mode = #tpu.pipeline_mode<synchronous>, transform_indices = @transform_9, window_bounds = array<i64: 128, 128>}, {pipeline_mode = #tpu.pipeline_mode<synchronous>, transform_indices = @transform_10, window_bounds = array<i64: 1, 128>}, {pipeline_mode = #tpu.pipeline_mode<synchronous>, transform_indices = @transform_11, window_bounds = array<i64: 128, 128>}, {pipeline_mode = #tpu.pipeline_mode<synchronous>, transform_indices = @transform_12, window_bounds = array<i64: 1, 128>}, {transform_indices = @transform_13, window_bounds = array<i64: 64, 5>}]} {
    %c0 = arith.constant 0 : index
    %c0_0 = arith.constant 0 : index
    %0 = vector.load %arg1[%c0, %c0_0] : memref<64x2xf32, #tpu.memory_space<vmem>>, vector<32x2xf32>
    %1 = vector.extract_strided_slice %0 {offsets = [0, 0], sizes = [32, 1], strides = [1, 1]} : vector<32x2xf32> to vector<32x1xf32>
    %c0_1 = arith.constant 0 : index
    %c0_2 = arith.constant 0 : index
    %2 = vector.load %arg2[%c0_1, %c0_2] : memref<2x128xf32, #tpu.memory_space<vmem>>, vector<1x128xf32>
    %3 = vector.broadcast %1 : vector<32x1xf32> to vector<32x128xf32>
    %4 = vector.broadcast %2 : vector<1x128xf32> to vector<32x128xf32>
    %5 = arith.mulf %3, %4 : vector<32x128xf32>
    %6 = vector.extract_strided_slice %0 {offsets = [0, 1], sizes = [32, 1], strides = [1, 1]} : vector<32x2xf32> to vector<32x1xf32>
    %c1 = arith.constant 1 : index
    %c0_3 = arith.constant 0 : index
    %7 = vector.load %arg2[%c1, %c0_3] : memref<2x128xf32, #tpu.memory_space<vmem>>, vector<1x128xf32>
    %8 = vector.broadcast %6 : vector<32x1xf32> to vector<32x128xf32>
    %9 = vector.broadcast %7 : vector<1x128xf32> to vector<32x128xf32>
    %10 = arith.mulf %8, %9 : vector<32x128xf32>
    %11 = arith.addf %5, %10 : vector<32x128xf32>
    %c0_4 = arith.constant 0 : index
    %c0_5 = arith.constant 0 : index
    %12 = vector.load %arg3[%c0_4, %c0_5] : memref<1x128xf32, #tpu.memory_space<vmem>>, vector<1x128xf32>
    %13 = vector.broadcast %12 : vector<1x128xf32> to vector<32x128xf32>
    %14 = arith.addf %11, %13 : vector<32x128xf32>
    %15 = arith.mulf %14, %14 : vector<32x128xf32>
    %16 = arith.addf %14, %15 : vector<32x128xf32>
    %17 = arith.truncf %16 : vector<32x128xf32> to vector<32x128xbf16>
    %c0_6 = arith.constant 0 : index
    %c0_7 = arith.constant 0 : index
    %18 = vector.load %arg4[%c0_6, %c0_7] : memref<128x128xbf16, #tpu.memory_space<vmem>>, vector<128x128xbf16>
    %cst = arith.constant dense<0.000000e+00> : vector<32x128xf32>
    %19 = tpu.matmul %17, %18, %cst {dimension_numbers = #tpu.dot_dimension_numbers<[1], [0], [0], [1], [0, 0, 1, 1], [], []>} : vector<32x128xbf16>, vector<128x128xbf16>, vector<32x128xf32> -> vector<32x128xf32>
    %c0_8 = arith.constant 0 : index
    %c0_9 = arith.constant 0 : index
    %20 = vector.load %arg5[%c0_8, %c0_9] : memref<1x128xf32, #tpu.memory_space<vmem>>, vector<1x128xf32>
    %21 = vector.broadcast %20 : vector<1x128xf32> to vector<32x128xf32>
    %22 = arith.addf %19, %21 : vector<32x128xf32>
    %23 = arith.mulf %22, %22 : vector<32x128xf32>
    %24 = arith.addf %22, %23 : vector<32x128xf32>
    %25 = arith.truncf %24 : vector<32x128xf32> to vector<32x128xbf16>
    %c0_10 = arith.constant 0 : index
    %c0_11 = arith.constant 0 : index
    %26 = vector.load %arg6[%c0_10, %c0_11] : memref<128x128xbf16, #tpu.memory_space<vmem>>, vector<128x128xbf16>
    %cst_12 = arith.constant dense<0.000000e+00> : vector<32x128xf32>
    %27 = tpu.matmul %25, %26, %cst_12 {dimension_numbers = #tpu.dot_dimension_numbers<[1], [0], [0], [1], [0, 0, 1, 1], [], []>} : vector<32x128xbf16>, vector<128x128xbf16>, vector<32x128xf32> -> vector<32x128xf32>
    %c0_13 = arith.constant 0 : index
    %c0_14 = arith.constant 0 : index
    %28 = vector.load %arg7[%c0_13, %c0_14] : memref<1x128xf32, #tpu.memory_space<vmem>>, vector<1x128xf32>
    %29 = vector.broadcast %28 : vector<1x128xf32> to vector<32x128xf32>
    %30 = arith.addf %27, %29 : vector<32x128xf32>
    %31 = arith.mulf %30, %30 : vector<32x128xf32>
    %32 = arith.addf %30, %31 : vector<32x128xf32>
    %33 = arith.truncf %32 : vector<32x128xf32> to vector<32x128xbf16>
    %c0_15 = arith.constant 0 : index
    %c0_16 = arith.constant 0 : index
    %34 = vector.load %arg8[%c0_15, %c0_16] : memref<128x128xbf16, #tpu.memory_space<vmem>>, vector<128x128xbf16>
    %cst_17 = arith.constant dense<0.000000e+00> : vector<32x128xf32>
    %35 = tpu.matmul %33, %34, %cst_17 {dimension_numbers = #tpu.dot_dimension_numbers<[1], [0], [0], [1], [0, 0, 1, 1], [], []>} : vector<32x128xbf16>, vector<128x128xbf16>, vector<32x128xf32> -> vector<32x128xf32>
    %c0_18 = arith.constant 0 : index
    %c0_19 = arith.constant 0 : index
    %36 = vector.load %arg9[%c0_18, %c0_19] : memref<1x128xf32, #tpu.memory_space<vmem>>, vector<1x128xf32>
    %37 = vector.broadcast %36 : vector<1x128xf32> to vector<32x128xf32>
    %38 = arith.addf %35, %37 : vector<32x128xf32>
    %39 = arith.mulf %38, %38 : vector<32x128xf32>
    %40 = arith.addf %38, %39 : vector<32x128xf32>
    %41 = arith.truncf %40 : vector<32x128xf32> to vector<32x128xbf16>
    %c0_20 = arith.constant 0 : index
    %c0_21 = arith.constant 0 : index
    %42 = vector.load %arg10[%c0_20, %c0_21] : memref<128x128xbf16, #tpu.memory_space<vmem>>, vector<128x128xbf16>
    %cst_22 = arith.constant dense<0.000000e+00> : vector<32x128xf32>
    %43 = tpu.matmul %41, %42, %cst_22 {dimension_numbers = #tpu.dot_dimension_numbers<[1], [0], [0], [1], [0, 0, 1, 1], [], []>} : vector<32x128xbf16>, vector<128x128xbf16>, vector<32x128xf32> -> vector<32x128xf32>
    %c0_23 = arith.constant 0 : index
    %c0_24 = arith.constant 0 : index
    %44 = vector.load %arg11[%c0_23, %c0_24] : memref<1x128xf32, #tpu.memory_space<vmem>>, vector<1x128xf32>
    %45 = vector.broadcast %44 : vector<1x128xf32> to vector<32x128xf32>
    %46 = arith.addf %43, %45 : vector<32x128xf32>
    %47 = arith.mulf %46, %46 : vector<32x128xf32>
    %48 = arith.addf %46, %47 : vector<32x128xf32>
    %49 = arith.truncf %48 : vector<32x128xf32> to vector<32x128xbf16>
    %c0_25 = arith.constant 0 : index
    %c0_26 = arith.constant 0 : index
    %50 = vector.load %arg12[%c0_25, %c0_26] : memref<128x128xbf16, #tpu.memory_space<vmem>>, vector<128x128xbf16>
    %cst_27 = arith.constant dense<0.000000e+00> : vector<32x128xf32>
    %51 = tpu.matmul %49, %50, %cst_27 {dimension_numbers = #tpu.dot_dimension_numbers<[1], [0], [0], [1], [0, 0, 1, 1], [], []>} : vector<32x128xbf16>, vector<128x128xbf16>, vector<32x128xf32> -> vector<32x128xf32>
    %c0_28 = arith.constant 0 : index
    %c0_29 = arith.constant 0 : index
    %52 = vector.load %arg13[%c0_28, %c0_29] : memref<1x128xf32, #tpu.memory_space<vmem>>, vector<1x128xf32>
    %53 = vector.broadcast %52 : vector<1x128xf32> to vector<32x128xf32>
    %54 = arith.addf %51, %53 : vector<32x128xf32>
    %55 = vector.extract_strided_slice %54 {offsets = [0, 0], sizes = [32, 5], strides = [1, 1]} : vector<32x128xf32> to vector<32x5xf32>
    %c32 = arith.constant 32 : index
    %c0_30 = arith.constant 0 : index
    %56 = vector.load %arg1[%c32, %c0_30] : memref<64x2xf32, #tpu.memory_space<vmem>>, vector<32x2xf32>
    %57 = vector.extract_strided_slice %56 {offsets = [0, 0], sizes = [32, 1], strides = [1, 1]} : vector<32x2xf32> to vector<32x1xf32>
    %c0_31 = arith.constant 0 : index
    %c0_32 = arith.constant 0 : index
    %58 = vector.load %arg2[%c0_31, %c0_32] : memref<2x128xf32, #tpu.memory_space<vmem>>, vector<1x128xf32>
    %59 = vector.broadcast %57 : vector<32x1xf32> to vector<32x128xf32>
    %60 = vector.broadcast %58 : vector<1x128xf32> to vector<32x128xf32>
    %61 = arith.mulf %59, %60 : vector<32x128xf32>
    %62 = vector.extract_strided_slice %56 {offsets = [0, 1], sizes = [32, 1], strides = [1, 1]} : vector<32x2xf32> to vector<32x1xf32>
    %c1_33 = arith.constant 1 : index
    %c0_34 = arith.constant 0 : index
    %63 = vector.load %arg2[%c1_33, %c0_34] : memref<2x128xf32, #tpu.memory_space<vmem>>, vector<1x128xf32>
    %64 = vector.broadcast %62 : vector<32x1xf32> to vector<32x128xf32>
    %65 = vector.broadcast %63 : vector<1x128xf32> to vector<32x128xf32>
    %66 = arith.mulf %64, %65 : vector<32x128xf32>
    %67 = arith.addf %61, %66 : vector<32x128xf32>
    %c0_35 = arith.constant 0 : index
    %c0_36 = arith.constant 0 : index
    %68 = vector.load %arg3[%c0_35, %c0_36] : memref<1x128xf32, #tpu.memory_space<vmem>>, vector<1x128xf32>
    %69 = vector.broadcast %68 : vector<1x128xf32> to vector<32x128xf32>
    %70 = arith.addf %67, %69 : vector<32x128xf32>
    %71 = arith.mulf %70, %70 : vector<32x128xf32>
    %72 = arith.addf %70, %71 : vector<32x128xf32>
    %73 = arith.truncf %72 : vector<32x128xf32> to vector<32x128xbf16>
    %c0_37 = arith.constant 0 : index
    %c0_38 = arith.constant 0 : index
    %74 = vector.load %arg4[%c0_37, %c0_38] : memref<128x128xbf16, #tpu.memory_space<vmem>>, vector<128x128xbf16>
    %cst_39 = arith.constant dense<0.000000e+00> : vector<32x128xf32>
    %75 = tpu.matmul %73, %74, %cst_39 {dimension_numbers = #tpu.dot_dimension_numbers<[1], [0], [0], [1], [0, 0, 1, 1], [], []>} : vector<32x128xbf16>, vector<128x128xbf16>, vector<32x128xf32> -> vector<32x128xf32>
    %c0_40 = arith.constant 0 : index
    %c0_41 = arith.constant 0 : index
    %76 = vector.load %arg5[%c0_40, %c0_41] : memref<1x128xf32, #tpu.memory_space<vmem>>, vector<1x128xf32>
    %77 = vector.broadcast %76 : vector<1x128xf32> to vector<32x128xf32>
    %78 = arith.addf %75, %77 : vector<32x128xf32>
    %79 = arith.mulf %78, %78 : vector<32x128xf32>
    %80 = arith.addf %78, %79 : vector<32x128xf32>
    %81 = arith.truncf %80 : vector<32x128xf32> to vector<32x128xbf16>
    %c0_42 = arith.constant 0 : index
    %c0_43 = arith.constant 0 : index
    %82 = vector.load %arg6[%c0_42, %c0_43] : memref<128x128xbf16, #tpu.memory_space<vmem>>, vector<128x128xbf16>
    %cst_44 = arith.constant dense<0.000000e+00> : vector<32x128xf32>
    %83 = tpu.matmul %81, %82, %cst_44 {dimension_numbers = #tpu.dot_dimension_numbers<[1], [0], [0], [1], [0, 0, 1, 1], [], []>} : vector<32x128xbf16>, vector<128x128xbf16>, vector<32x128xf32> -> vector<32x128xf32>
    %c0_45 = arith.constant 0 : index
    %c0_46 = arith.constant 0 : index
    %84 = vector.load %arg7[%c0_45, %c0_46] : memref<1x128xf32, #tpu.memory_space<vmem>>, vector<1x128xf32>
    %85 = vector.broadcast %84 : vector<1x128xf32> to vector<32x128xf32>
    %86 = arith.addf %83, %85 : vector<32x128xf32>
    %87 = arith.mulf %86, %86 : vector<32x128xf32>
    %88 = arith.addf %86, %87 : vector<32x128xf32>
    %89 = arith.truncf %88 : vector<32x128xf32> to vector<32x128xbf16>
    %c0_47 = arith.constant 0 : index
    %c0_48 = arith.constant 0 : index
    %90 = vector.load %arg8[%c0_47, %c0_48] : memref<128x128xbf16, #tpu.memory_space<vmem>>, vector<128x128xbf16>
    %cst_49 = arith.constant dense<0.000000e+00> : vector<32x128xf32>
    %91 = tpu.matmul %89, %90, %cst_49 {dimension_numbers = #tpu.dot_dimension_numbers<[1], [0], [0], [1], [0, 0, 1, 1], [], []>} : vector<32x128xbf16>, vector<128x128xbf16>, vector<32x128xf32> -> vector<32x128xf32>
    %c0_50 = arith.constant 0 : index
    %c0_51 = arith.constant 0 : index
    %92 = vector.load %arg9[%c0_50, %c0_51] : memref<1x128xf32, #tpu.memory_space<vmem>>, vector<1x128xf32>
    %93 = vector.broadcast %92 : vector<1x128xf32> to vector<32x128xf32>
    %94 = arith.addf %91, %93 : vector<32x128xf32>
    %95 = arith.mulf %94, %94 : vector<32x128xf32>
    %96 = arith.addf %94, %95 : vector<32x128xf32>
    %97 = arith.truncf %96 : vector<32x128xf32> to vector<32x128xbf16>
    %c0_52 = arith.constant 0 : index
    %c0_53 = arith.constant 0 : index
    %98 = vector.load %arg10[%c0_52, %c0_53] : memref<128x128xbf16, #tpu.memory_space<vmem>>, vector<128x128xbf16>
    %cst_54 = arith.constant dense<0.000000e+00> : vector<32x128xf32>
    %99 = tpu.matmul %97, %98, %cst_54 {dimension_numbers = #tpu.dot_dimension_numbers<[1], [0], [0], [1], [0, 0, 1, 1], [], []>} : vector<32x128xbf16>, vector<128x128xbf16>, vector<32x128xf32> -> vector<32x128xf32>
    %c0_55 = arith.constant 0 : index
    %c0_56 = arith.constant 0 : index
    %100 = vector.load %arg11[%c0_55, %c0_56] : memref<1x128xf32, #tpu.memory_space<vmem>>, vector<1x128xf32>
    %101 = vector.broadcast %100 : vector<1x128xf32> to vector<32x128xf32>
    %102 = arith.addf %99, %101 : vector<32x128xf32>
    %103 = arith.mulf %102, %102 : vector<32x128xf32>
    %104 = arith.addf %102, %103 : vector<32x128xf32>
    %105 = arith.truncf %104 : vector<32x128xf32> to vector<32x128xbf16>
    %c0_57 = arith.constant 0 : index
    %c0_58 = arith.constant 0 : index
    %106 = vector.load %arg12[%c0_57, %c0_58] : memref<128x128xbf16, #tpu.memory_space<vmem>>, vector<128x128xbf16>
    %cst_59 = arith.constant dense<0.000000e+00> : vector<32x128xf32>
    %107 = tpu.matmul %105, %106, %cst_59 {dimension_numbers = #tpu.dot_dimension_numbers<[1], [0], [0], [1], [0, 0, 1, 1], [], []>} : vector<32x128xbf16>, vector<128x128xbf16>, vector<32x128xf32> -> vector<32x128xf32>
    %c0_60 = arith.constant 0 : index
    %c0_61 = arith.constant 0 : index
    %108 = vector.load %arg13[%c0_60, %c0_61] : memref<1x128xf32, #tpu.memory_space<vmem>>, vector<1x128xf32>
    %109 = vector.broadcast %108 : vector<1x128xf32> to vector<32x128xf32>
    %110 = arith.addf %107, %109 : vector<32x128xf32>
    %111 = vector.extract_strided_slice %110 {offsets = [0, 0], sizes = [32, 5], strides = [1, 1]} : vector<32x128xf32> to vector<32x5xf32>
    %c0_62 = arith.constant 0 : index
    %c0_63 = arith.constant 0 : index
    %112 = vector.load %arg14[%c0_62, %c0_63] : memref<64x5xf32, #tpu.memory_space<vmem>>, vector<32x5xf32>
    tpu.vector_store %arg14[%c0_62, %c0_63], %55 {strides = array<i32>} : memref<64x5xf32, #tpu.memory_space<vmem>>, vector<32x5xf32>,
    %c32_64 = arith.constant 32 : index
    %c0_65 = arith.constant 0 : index
    %113 = vector.load %arg14[%c32_64, %c0_65] : memref<64x5xf32, #tpu.memory_space<vmem>>, vector<32x5xf32>
    tpu.vector_store %arg14[%c32_64, %c0_65], %111 {strides = array<i32>} : memref<64x5xf32, #tpu.memory_space<vmem>>, vector<32x5xf32>,
    return
  }
  func.func @transform_0(%arg0: i32) -> (i32, i32) {
    %c0_i32 = arith.constant 0 : i32
    %c0_i32_0 = arith.constant 0 : i32
    return %arg0, %c0_i32 : i32, i32
  }
  func.func @transform_1(%arg0: i32) -> (i32, i32) {
    %c0_i32 = arith.constant 0 : i32
    %c0_i32_0 = arith.constant 0 : i32
    %c0_i32_1 = arith.constant 0 : i32
    return %c0_i32, %c0_i32_0 : i32, i32
  }
  func.func @transform_2(%arg0: i32) -> (i32, i32) {
    %c0_i32 = arith.constant 0 : i32
    %c0_i32_0 = arith.constant 0 : i32
    %c0_i32_1 = arith.constant 0 : i32
    return %c0_i32, %c0_i32_0 : i32, i32
  }
  func.func @transform_3(%arg0: i32) -> (i32, i32) {
    %c0_i32 = arith.constant 0 : i32
    %c0_i32_0 = arith.constant 0 : i32
    %c0_i32_1 = arith.constant 0 : i32
    return %c0_i32, %c0_i32_0 : i32, i32
  }
  func.func @transform_4(%arg0: i32) -> (i32, i32) {
    %c0_i32 = arith.constant 0 : i32
    %c0_i32_0 = arith.constant 0 : i32
    %c0_i32_1 = arith.constant 0 : i32
    return %c0_i32, %c0_i32_0 : i32, i32
  }
  func.func @transform_5(%arg0: i32) -> (i32, i32) {
    %c0_i32 = arith.constant 0 : i32
    %c0_i32_0 = arith.constant 0 : i32
    %c0_i32_1 = arith.constant 0 : i32
    return %c0_i32, %c0_i32_0 : i32, i32
  }
  func.func @transform_6(%arg0: i32) -> (i32, i32) {
    %c0_i32 = arith.constant 0 : i32
    %c0_i32_0 = arith.constant 0 : i32
    %c0_i32_1 = arith.constant 0 : i32
    return %c0_i32, %c0_i32_0 : i32, i32
  }
  func.func @transform_7(%arg0: i32) -> (i32, i32) {
    %c0_i32 = arith.constant 0 : i32
    %c0_i32_0 = arith.constant 0 : i32
    %c0_i32_1 = arith.constant 0 : i32
    return %c0_i32, %c0_i32_0 : i32, i32
  }
  func.func @transform_8(%arg0: i32) -> (i32, i32) {
    %c0_i32 = arith.constant 0 : i32
    %c0_i32_0 = arith.constant 0 : i32
    %c0_i32_1 = arith.constant 0 : i32
    return %c0_i32, %c0_i32_0 : i32, i32
  }
  func.func @transform_9(%arg0: i32) -> (i32, i32) {
    %c0_i32 = arith.constant 0 : i32
    %c0_i32_0 = arith.constant 0 : i32
    %c0_i32_1 = arith.constant 0 : i32
    return %c0_i32, %c0_i32_0 : i32, i32
  }
  func.func @transform_10(%arg0: i32) -> (i32, i32) {
    %c0_i32 = arith.constant 0 : i32
    %c0_i32_0 = arith.constant 0 : i32
    %c0_i32_1 = arith.constant 0 : i32
    return %c0_i32, %c0_i32_0 : i32, i32
  }
  func.func @transform_11(%arg0: i32) -> (i32, i32) {
    %c0_i32 = arith.constant 0 : i32
    %c0_i32_0 = arith.constant 0 : i32
    %c0_i32_1 = arith.constant 0 : i32
    return %c0_i32, %c0_i32_0 : i32, i32
  }
  func.func @transform_12(%arg0: i32) -> (i32, i32) {
    %c0_i32 = arith.constant 0 : i32
    %c0_i32_0 = arith.constant 0 : i32
    %c0_i32_1 = arith.constant 0 : i32
    return %c0_i32, %c0_i32_0 : i32, i32
  }
  func.func @transform_13(%arg0: i32) -> (i32, i32) {
    %c0_i32 = arith.constant 0 : i32
    %c0_i32_0 = arith.constant 0 : i32
    return %arg0, %c0_i32 : i32, i32
  }
}

</mosaic_0001>

<bundles_post_ra>
// kernel: pinn_forward.1
= control target key start
LH: loop header
LB: loop body
LE: loop exit
PB: predicated region body
PF: predicated region fallthrough
CT: control target
= control target key end

     0   :  { %s2084_s25 = smov 0   ;;  %s2611_s0 = inlined_call_operand.vmem [shape: f32[128,2], index: 0, kind: input, shape index: {}]   ;;  %s2612_s1 = inlined_call_operand.vmem [shape: f32[2,128], index: 1, kind: input, shape index: {}]   ;;  %s2613_s2 = inlined_call_operand.vmem [shape: f32[1,128], index: 2, kind: input, shape index: {}]   ;;  %s2614_s3 = inlined_call_operand.vmem [shape: bf16[128,128], index: 3, kind: input, shape index: {}]   ;;  %s2615_s4 = inlined_call_operand.vmem [shape: f32[1,128], index: 4, kind: input, shape index: {}]   ;;  %s2616_s5 = inlined_call_operand.vmem [shape: bf16[128,128], index: 5, kind: input, shape index: {}]   ;;  %s2617_s6 = inlined_call_operand.vmem [shape: f32[1,128], index: 6, kind: input, shape index: {}]   ;;  %s2618_s7 = inlined_call_operand.vmem [shape: bf16[128,128], index: 7, kind: input, shape index: {}]   ;;  %s2619_s8 = inlined_call_operand.vmem [shape: f32[1,128], index: 8, kind: input, shape index: {}]   ;;  %s2620_s9 = inlined_call_operand.vmem [shape: bf16[128,128], index: 9, kind: input, shape index: {}]   ;;  %s2621_s10 = inlined_call_operand.vmem [shape: f32[1,128], index: 10, kind: input, shape index: {}]   ;;  %s2622_s11 = inlined_call_operand.vmem [shape: bf16[128,128], index: 11, kind: input, shape index: {}]   ;;  %s2623_s12 = inlined_call_operand.vmem [shape: f32[1,128], index: 12, kind: input, shape index: {}]   ;;  %s2624_s13 = inlined_call_operand.vmem [shape: f32[128,5], index: 13, kind: output, shape index: {}]  }
   0x1 LB: > { %s1584_s26 = sadd.s32 4294967295, %s2010_s25   ;;  %p1588_p0 = scmp.ge.s32.totalorder %s2010_s25, 1  ;;  %s2010_s25 = sphi %s2084_s25, %s23_s25  }
   0x2   : > { %p388_p1 = scmp.lt.s32.totalorder %s2010_s25, 3 }
   0x4   : > { %p389_p2 = pnand %p1588_p0, %p388_p1 }
   0x6   : > { %392 = sbr.rel (%p389_p2) target bundleno = 1992 (0x7c8), region = 72 }
   0xd   : > { %s1589_s27 = sshll.u32 %s1584_s26, 3  ;;  %v2095_v0 = vld [vmem:[%s2614_s3] sm:$0xff]   ;;  %v2012_v1 = vmov 1   ;;  %v2013_v2 = vmov 0   ;;  %v2102_v3 = vld [vmem:[%s2614_s3 + $0x8] sm:$0xff]   ;;  %v2123_v6 = vld [vmem:[%s2614_s3 + $0x10] sm:$0xff]  }
   0xe   : > { %1954 = vset.pattern.permute.xlu1 %v2012_v1  ;;  %1953 = vset.pattern.permute.xlu0 %v2013_v2  ;;  %p433_p3 = scmp.lt.s32.totalorder %s1589_s27, 15  ;;  %v2132_v9 = vld [vmem:[%s2614_s3 + $0x18] sm:$0xff]   ;;  %v2140_v10 = vld [vmem:[%s2614_s3 + $0x20] sm:$0xff]   ;;  %v2148_v11 = vld [vmem:[%s2614_s3 + $0x28] sm:$0xff]   ;;  %vm1519_vm0 = vcmask 39936  }
   0xf   : > { %1743 = vmatprep.subr.bf16.mxu0 %v2095_v0  ;;  %v2156_v12 = vld [vmem:[%s2614_s3 + $0x30] sm:$0xff]   ;;  %v2165_v13 = vld [vmem:[%s2614_s3 + $0x38] sm:$0xff]   ;;  %v2172_v14 = vld [vmem:[%s2616_s5] sm:$0xff]  }
  0x10   : > { %s2638_s27 = smov (!%p433_p3, %s1589_s27), 15  ;;  %1744 = vmatpush3.bf16.msra.mxu0 %v2095_v0  ;;  %v2177_v15 = vld [vmem:[%s2616_s5 + $0x8] sm:$0xff]   ;;  %1763 = vmatprep.subr.bf16.mxu1 %v2172_v14  ;;  %v2185_v16 = vld [vmem:[%s2616_s5 + $0x10] sm:$0xff]   ;;  %v2192_v17 = vld [vmem:[%s2616_s5 + $0x18] sm:$0xff]  }
  0x11   : > { %1745 = vmatprep.subr.bf16.mxu0 %v2102_v3  ;;  %s1590_s15 = sshll.u32 %s2638_s27, 3  ;;  %1764 = vmatpush3.bf16.msra.mxu1 %v2172_v14  ;;  %v2199_v18 = vld [vmem:[%s2616_s5 + $0x20] sm:$0xff]   ;;  %v2234_v56 = vld [vmem:[%s2616_s5 + $0x28] sm:$0xff]   ;;  %v2241_v57 = vld [vmem:[%s2616_s5 + $0x30] sm:$0xff]  }
  0x12   : > { %s2115_s18 = scalar_lea.vmem %s2611_s0, %s1590_s15  ;;  %1765 = vmatprep.subr.bf16.mxu1 %v2177_v15  ;;  %v2207_v19 = vld [vmem:[%s2612_s1 + $0x1] ss:$0 sm:$0xff]  ;;  %v2212_v20 = vld [vmem:[%s2612_s1] ss:$0 sm:$0xff]  ;;  %v2248_v58 = vld [vmem:[%s2616_s5 + $0x38] sm:$0xff]   ;;  %s2555_s19 = scalar_lea.vmem %s2624_s13, %s1590_s15 }
  0x13   : > { %v445_v4 = vld [vmem:[%s2115_s18] sm:$0xff]  ;;  %v446_v5 = vld [vmem:[%s2115_s18 + $0x8] sm:$0xff]  ;;  %v447_v7 = vld [vmem:[%s2115_s18 + $0x10] sm:$0xff] }
  0x14   : > { %1746 = vmatpush3.bf16.msra.mxu0 %v2102_v3  ;;  %480 = vperm.xlu1 %1954, %v445_v4   ;;  %v448_v8 = vld [vmem:[%s2115_s18 + $0x18] sm:$0xff]  ;;  %v2219_v25 = vld [vmem:[%s2613_s2] ss:$0 sm:$0xff]  ;;  %v2260_v60 = vld [vmem:[%s2618_s7 + $0x8] sm:$0xff]  }
  0x15   : > { %452 = vperm.xlu0 %1953, %v445_v4   ;;  %1747 = vmatprep.subr.bf16.mxu0 %v2123_v6  ;;  %v2255_v59 = vld [vmem:[%s2618_s7] sm:$0xff]   ;;  %v2268_v61 = vld [vmem:[%s2618_s7 + $0x10] sm:$0xff]   ;;  %v2275_v62 = vld [vmem:[%s2618_s7 + $0x18] sm:$0xff]  }
  0x16   : > { %1766 = vmatpush3.bf16.msra.mxu1 %v2177_v15  ;;  %v2282_v63 = vld [vmem:[%s2618_s7 + $0x20] sm:$0xff]  }
  0x17   : > { %1767 = vmatprep.subr.bf16.mxu1 %v2185_v16  ;;  %v2290_v4 = vld [vmem:[%s2615_s4] ss:$0 sm:$0xff] }
  0x18   : > { %1748 = vmatpush3.bf16.msra.mxu0 %v2123_v6  ;;  %484 = vperm.xlu1 %1954, %v446_v5  }
  0x19   : > { %457 = vperm.xlu0 %1953, %v446_v5   ;;  %1749 = vmatprep.subr.bf16.mxu0 %v2132_v9 }
  0x1a   : > { %1768 = vmatpush3.bf16.msra.mxu1 %v2185_v16 }
  0x1b   : > { %1769 = vmatprep.subr.bf16.mxu1 %v2192_v17 }
  0x1c   : > { %1750 = vmatpush3.bf16.msra.mxu0 %v2132_v9  ;;  %1955 = vset.pattern.permute.xlu1 %v2013_v2 }
  0x1d   : > { %462 = vperm.xlu0 %1953, %v447_v7   ;;  %467 = vperm.xlu1 %1955, %v448_v8  }
  0x1e   : > { %1751 = vmatprep.subr.bf16.mxu0 %v2140_v10  ;;  %1770 = vmatpush3.bf16.msra.mxu1 %v2192_v17 }
  0x1f   : > { %1771 = vmatprep.subr.bf16.mxu1 %v2199_v18 }
  0x20   : > { %1752 = vmatpush3.bf16.msra.mxu0 %v2140_v10 }
  0x21   : > { %1956 = vset.pattern.permute.xlu0 %v2012_v1  ;;  %1957 = vset.pattern.permute.xlu1 %v2012_v1 }
  0x22   : > { %488 = vperm.xlu0 %1956, %v447_v7   ;;  %492 = vperm.xlu1 %1957, %v448_v8  }
  0x23   : > { %1753 = vmatprep.subr.bf16.mxu0 %v2148_v11  ;;  %1772 = vmatpush3.bf16.msra.mxu1 %v2199_v18 }
  0x24   : > { %1754 = vmatpush3.bf16.msra.mxu0 %v2148_v11  ;;  %1773 = vmatprep.subr.bf16.mxu1 %v2234_v56 }
  0x25   : > { %1755 = vmatprep.subr.bf16.mxu0 %v2156_v12 }
  0x26   : > { %1959 = vset.pattern.permute.xlu0 %v2013_v2  ;;  %1958 = vset.pattern.permute.xlu1 %v2013_v2 }
  0x27   : > { %1774 = vmatpush3.bf16.msra.mxu1 %v2234_v56 }
  0x28   : > { %1756 = vmatpush3.bf16.msra.mxu0 %v2156_v12  ;;  %1775 = vmatprep.subr.bf16.mxu1 %v2241_v57 }
  0x29   : > { %1757 = vmatprep.subr.bf16.mxu0 %v2165_v13 }
  0x2b   : > { %1776 = vmatpush3.bf16.msra.mxu1 %v2241_v57 }
  0x2c   : > { %1758 = vmatpush3.bf16.msra.mxu0 %v2165_v13  ;;  %1777 = vmatprep.subr.bf16.mxu1 %v2248_v58 }
  0x2d   : > { %1783 = vmatprep.subr.bf16.mxu0 %v2255_v59 }
  0x2f   : > { %1778 = vmatpush3.bf16.msra.mxu1 %v2248_v58 }
  0x93   : > { %v481_v21 = vpop.permute.xlu1 %480 }
  0x94   : > { %v453_v22 = vpop.permute.xlu0 %452  ;;  %v499_v23 = vmul.f32 %v2207_v19, %v481_v21 }
  0x95   : > { %v474_v24 = vmul.f32 %v2212_v20, %v453_v22 }
  0x97   : > { %v503_v26 = vadd.f32 %v499_v23, %v474_v24  ;;  %v485_v27 = vpop.permute.xlu1 %484 }
  0x98   : > { %v458_v28 = vpop.permute.xlu0 %457  ;;  %v500_v29 = vmul.f32 %v2207_v19, %v485_v27 }
  0x99   : > { %v475_v30 = vmul.f32 %v2212_v20, %v458_v28  ;;  %v514_v31 = vadd.f32 %v2219_v25, %v503_v26 }
  0x9b   : > { %v504_v32 = vadd.f32 %v500_v29, %v475_v30  ;;  %v518_v36 = vmul.f32 %v514_v31, %v514_v31 }
  0x9c   : > { %v463_v33 = vpop.permute.xlu0 %462  ;;  %v468_v34 = vpop.permute.xlu1 %467 }
  0x9d   : > { %v515_v35 = vadd.f32 %v2219_v25, %v504_v32  ;;  %v522_v39 = vadd.f32 %v518_v36, %v514_v31  ;;  %v476_v41 = vmul.f32 %v2212_v20, %v463_v33  ;;  %v477_v44 = vmul.f32 %v2212_v20, %v468_v34 }
  0x9f   : > { %v519_v37 = vmul.f32 %v515_v35, %v515_v35 }
  0xa1   : > { %v489_v38 = vpop.permute.xlu0 %488  ;;  %v523_v40 = vadd.f32 %v519_v37, %v515_v35  ;;  %v493_v43 = vpop.permute.xlu1 %492  ;;  %v2299_v37 = vld [vmem:[%s2618_s7 + $0x28] sm:$0xff]  }
  0xa2   : > { %v501_v42 = vmul.f32 %v2207_v19, %v489_v38  ;;  %v502_v45 = vmul.f32 %v2207_v19, %v493_v43  ;;  %v2306_v38 = vld [vmem:[%s2618_s7 + $0x30] sm:$0xff]  }
  0xa3   : > { %v526_v46 = vpack.c.bf16 %v523_v40, %v522_v39  ;;  %v2313_v39 = vld [vmem:[%s2618_s7 + $0x38] sm:$0xff]   ;;  %v1168_v40 = vld [vmem:[%s2115_s18 + $0x20] sm:$0xff]  ;;  %v1170_v43 = vld [vmem:[%s2115_s18 + $0x30] sm:$0xff] }
  0xa4   : > { %v505_v47 = vadd.f32 %v501_v42, %v476_v41  ;;  %v506_v48 = vadd.f32 %v502_v45, %v477_v44  ;;  %v1169_v41 = vld [vmem:[%s2115_s18 + $0x28] sm:$0xff]  ;;  %1174 = vperm.xlu1 %1958, %v1168_v40   ;;  %v2322_v42 = vld [vmem:[%s2620_s9] sm:$0xff]   ;;  %v2336_v45 = vld [vmem:[%s2620_s9 + $0x10] sm:$0xff]  }
  0xa5   : > { %1759 = vmatprep.mubr.bf16.mxu0 %v526_v46  ;;  %1179 = vperm.xlu0 %1959, %v1169_v41   ;;  %v2328_v44 = vld [vmem:[%s2620_s9 + $0x8] sm:$0xff]   ;;  %v2345_v46 = vld [vmem:[%s2620_s9 + $0x18] sm:$0xff]  }
  0xa6   : > { %v516_v49 = vadd.f32 %v2219_v25, %v505_v47  ;;  %v517_v50 = vadd.f32 %v2219_v25, %v506_v48  ;;  %1803 = vmatprep.subr.bf16.mxu1 %v2322_v42  ;;  %v1171_v47 = vld [vmem:[%s2115_s18 + $0x38] sm:$0xff]  ;;  %v2353_v48 = vld [vmem:[%s2620_s9 + $0x20] sm:$0xff]  }
  0xa8   : > { %v520_v51 = vmul.f32 %v516_v49, %v516_v49  ;;  %v521_v52 = vmul.f32 %v517_v50, %v517_v50  ;;  %1960 = vset.pattern.permute.xlu1 %v2012_v1 }
  0xa9   : > { %1184 = vperm.xlu0 %1959, %v1170_v43   ;;  %1197 = vperm.xlu1 %1960, %v1168_v40  }
  0xaa   : > { %v524_v53 = vadd.f32 %v520_v51, %v516_v49  ;;  %v525_v54 = vadd.f32 %v521_v52, %v517_v50  ;;  %v2363_v49 = vld [vmem:[%s2617_s6] ss:$0 sm:$0xff] }
  0xac   : > { %v527_v55 = vpack.c.bf16 %v525_v54, %v524_v53 }
  0xad   : > { %1962 = vset.pattern.permute.xlu0 %v2012_v1  ;;  %1201 = vperm.xlu1 %1960, %v1169_v41  }
  0xae   : > { %1760 = vmatmul.mubr.bf16.vlgmr.msra.gmra.mrb[0].mxu0 %v527_v55  ;;  %1205 = vperm.xlu0 %1962, %v1170_v43  }
  0xaf   : > { %1784 = vmatpush3.bf16.msra.mxu0 %v2255_v59 }
  0xb0   : > { %1785 = vmatprep.subr.bf16.mxu0 %v2260_v60 }
  0xb1   : > { %1961 = vset.pattern.permute.xlu1 %v2013_v2 }
  0xb2   : > { %1189 = vperm.xlu1 %1961, %v1171_v47  }
  0xb3   : > { %1786 = vmatpush3.bf16.msra.mxu0 %v2260_v60 }
  0xb4   : > { %1787 = vmatprep.subr.bf16.mxu0 %v2268_v61 }
  0xb6   : > { %1963 = vset.pattern.permute.xlu1 %v2012_v1 }
  0xb7   : > { %1788 = vmatpush3.bf16.msra.mxu0 %v2268_v61  ;;  %1209 = vperm.xlu1 %1963, %v1171_v47  }
  0xb8   : > { %1789 = vmatprep.subr.bf16.mxu0 %v2275_v62 }
  0xbb   : > { %1790 = vmatpush3.bf16.msra.mxu0 %v2275_v62 }
  0xbc   : > { %1791 = vmatprep.subr.bf16.mxu0 %v2282_v63 }
  0xbf   : > { %1792 = vmatpush3.bf16.msra.mxu0 %v2282_v63 }
  0xc0   : > { %1793 = vmatprep.subr.bf16.mxu0 %v2299_v37 }
  0xc3   : > { %1794 = vmatpush3.bf16.msra.mxu0 %v2299_v37 }
  0xc4   : > { %1795 = vmatprep.subr.bf16.mxu0 %v2306_v38 }
  0xc7   : > { %1796 = vmatpush3.bf16.msra.mxu0 %v2306_v38 }
  0xc8   : > { %1797 = vmatprep.subr.bf16.mxu0 %v2313_v39 }
  0xcb   : > { %1798 = vmatpush3.bf16.msra.mxu0 %v2313_v39 }
 0x123   : > { %v1175_v40 = vpop.permute.xlu1 %1174 }
 0x124   : > { %v1180_v47 = vpop.permute.xlu0 %1179 }
 0x128   : > { %v1198_v41 = vpop.permute.xlu1 %1197 }
 0x12c   : > { %v1202_v43 = vpop.permute.xlu1 %1201 }
 0x181   : > { %v1761_v5 = vpop.f32.mrb[0].mxu0 }
 0x182   : > { %v642_v7 = vadd.f32 %v1761_v5, %v2290_v4  ;;  %v633_v8 = vpop.f32.mrb[1].mxu0 }
 0x183   : > { %v634_v21 = vadd.f32 %v2290_v4, %v633_v8  ;;  %v1762_v22 = vpop.f32.mrb[2].mxu0 }
 0x184   : > { %v650_v23 = vmul.f32 %v642_v7, %v642_v7  ;;  %v645_v24 = vadd.f32 %v1762_v22, %v2290_v4  ;;  %v636_v26 = vpop.f32.mrb[3].mxu0 }
 0x185   : > { %v648_v27 = vmul.f32 %v634_v21, %v634_v21  ;;  %v637_v28 = vadd.f32 %v2290_v4, %v636_v26 }
 0x186   : > { %v651_v29 = vmul.f32 %v645_v24, %v645_v24  ;;  %v654_v31 = vadd.f32 %v650_v23, %v642_v7 }
 0x187   : > { %v649_v30 = vmul.f32 %v637_v28, %v637_v28  ;;  %v652_v33 = vadd.f32 %v648_v27, %v634_v21 }
 0x188   : > { %v655_v32 = vadd.f32 %v651_v29, %v645_v24  ;;  %v2372_v29 = vld [vmem:[%s2620_s9 + $0x28] sm:$0xff]  }
 0x189   : > { %v653_v34 = vadd.f32 %v649_v30, %v637_v28  ;;  %v2379_v30 = vld [vmem:[%s2620_s9 + $0x30] sm:$0xff]  }
 0x18a   : > { %v657_v35 = vpack.c.bf16 %v655_v32, %v654_v31  ;;  %v2386_v31 = vld [vmem:[%s2620_s9 + $0x38] sm:$0xff]   ;;  %v2394_v32 = vld [vmem:[%s2622_s11] sm:$0xff]  }
 0x18b   : > { %v656_v36 = vpack.c.bf16 %v653_v34, %v652_v33  ;;  %v2399_v33 = vld [vmem:[%s2622_s11 + $0x8] sm:$0xff]   ;;  %1823 = vmatprep.subr.bf16.mxu0 %v2394_v32  ;;  %v2407_v34 = vld [vmem:[%s2622_s11 + $0x10] sm:$0xff]  }
 0x18c   : > { %2631 = vst [vmem:[#allocation2_spill] sm:$0xff] %v2407_v34 }
 0x18d   : > { %1779 = vmatprep.mubr.bf16.mxu1 %v656_v36  ;;  %v2421_v36 = vld [vmem:[%s2622_s11 + $0x20] sm:$0xff]  }
 0x18e   : > { %1780 = vmatmul.mubr.bf16.vlgmr.msra.gmra.mrb[0].mxu1 %v657_v35  ;;  %v2414_v35 = vld [vmem:[%s2622_s11 + $0x18] sm:$0xff]   ;;  %2633 = vst [vmem:[#allocation4_spill] sm:$0xff] %v2421_v36 }
 0x18f   : > { %1804 = vmatpush3.bf16.msra.mxu1 %v2322_v42  ;;  %2632 = vst [vmem:[#allocation3_spill] sm:$0xff] %v2414_v35 }
 0x190   : > { %1805 = vmatprep.subr.bf16.mxu1 %v2328_v44 }
 0x193   : > { %1806 = vmatpush3.bf16.msra.mxu1 %v2328_v44 }
 0x194   : > { %1807 = vmatprep.subr.bf16.mxu1 %v2336_v45 }
 0x197   : > { %1808 = vmatpush3.bf16.msra.mxu1 %v2336_v45 }
 0x198   : > { %1809 = vmatprep.subr.bf16.mxu1 %v2345_v46 }
 0x19b   : > { %1810 = vmatpush3.bf16.msra.mxu1 %v2345_v46 }
 0x19c   : > { %1811 = vmatprep.subr.bf16.mxu1 %v2353_v48 }
 0x19f   : > { %1812 = vmatpush3.bf16.msra.mxu1 %v2353_v48 }
 0x1a0   : > { %1813 = vmatprep.subr.bf16.mxu1 %v2372_v29 }
 0x1a3   : > { %1814 = vmatpush3.bf16.msra.mxu1 %v2372_v29 }
 0x1a4   : > { %1815 = vmatprep.subr.bf16.mxu1 %v2379_v30 }
 0x1a7   : > { %1816 = vmatpush3.bf16.msra.mxu1 %v2379_v30 }
 0x1a8   : > { %1817 = vmatprep.subr.bf16.mxu1 %v2386_v31 }
 0x1ab   : > { %1818 = vmatpush3.bf16.msra.mxu1 %v2386_v31 }
 0x1ac   : > { %1843 = vmatprep.subr.bf16.mxu1 %v2095_v0 }
 0x261   : > { %v1781_v50 = vpop.f32.mrb[0].mxu1 }
 0x262   : > { %v772_v51 = vadd.f32 %v1781_v50, %v2363_v49  ;;  %v763_v52 = vpop.f32.mrb[1].mxu1  ;;  %v1192_v50 = vmul.f32 %v2212_v20, %v1175_v40 }
 0x263   : > { %v764_v2 = vadd.f32 %v2363_v49, %v763_v52  ;;  %v1782_v53 = vpop.f32.mrb[2].mxu1  ;;  %v1213_v52 = vmul.f32 %v2207_v19, %v1202_v43 }
 0x264   : > { %v780_v54 = vmul.f32 %v772_v51, %v772_v51  ;;  %v775_v55 = vadd.f32 %v1782_v53, %v2363_v49  ;;  %v766_v5 = vpop.f32.mrb[3].mxu1 }
 0x265   : > { %v778_v1 = vmul.f32 %v764_v2, %v764_v2  ;;  %v767_v7 = vadd.f32 %v2363_v49, %v766_v5 }
 0x266   : > { %v781_v8 = vmul.f32 %v775_v55, %v775_v55  ;;  %v784_v22 = vadd.f32 %v780_v54, %v772_v51  ;;  %v1212_v51 = vmul.f32 %v2207_v19, %v1198_v41 }
 0x267   : > { %v779_v21 = vmul.f32 %v767_v7, %v767_v7  ;;  %v782_v24 = vadd.f32 %v778_v1, %v764_v2  ;;  %v1193_v2 = vmul.f32 %v2212_v20, %v1180_v47 }
 0x268   : > { %v785_v23 = vadd.f32 %v781_v8, %v775_v55  ;;  %v1216_v53 = vadd.f32 %v1212_v51, %v1192_v50  ;;  %v2433_v55 = vld [vmem:[%s2619_s8] ss:$0 sm:$0xff] }
 0x269   : > { %v783_v26 = vadd.f32 %v779_v21, %v767_v7  ;;  %v1217_v54 = vadd.f32 %v1213_v52, %v1193_v2 }
 0x26a   : > { %v787_v27 = vpack.c.bf16 %v785_v23, %v784_v22  ;;  %v1220_v5 = vadd.f32 %v2219_v25, %v1216_v53 }
 0x26b   : > { %v786_v28 = vpack.c.bf16 %v783_v26, %v782_v24  ;;  %v1221_v1 = vadd.f32 %v2219_v25, %v1217_v54 }
 0x26c   : > { %v1224_v24 = vmul.f32 %v1220_v5, %v1220_v5 }
 0x26d   : > { %1799 = vmatprep.mubr.bf16.mxu0 %v786_v28  ;;  %v1225_v26 = vmul.f32 %v1221_v1, %v1221_v1 }
 0x26e   : > { %1800 = vmatmul.mubr.bf16.vlgmr.msra.gmra.mrb[4].mxu0 %v787_v27  ;;  %v1228_v51 = vadd.f32 %v1224_v24, %v1220_v5 }
 0x26f   : > { %1824 = vmatpush3.bf16.msra.mxu0 %v2394_v32  ;;  %v1229_v52 = vadd.f32 %v1225_v26, %v1221_v1 }
 0x270   : > { %1825 = vmatprep.subr.bf16.mxu0 %v2399_v33 }
 0x273   : > { %1826 = vmatpush3.bf16.msra.mxu0 %v2399_v33 }
 0x274   : > { %1827 = vmatprep.subr.bf16.mxu0 %v2407_v34 }
 0x277   : > { %1828 = vmatpush3.bf16.msra.mxu0 %v2407_v34  ;;  %v1185_v34 = vpop.permute.xlu0 %1184 }
 0x278   : > { %1829 = vmatprep.subr.bf16.mxu0 %v2414_v35 }
 0x27b   : > { %1830 = vmatpush3.bf16.msra.mxu0 %v2414_v35  ;;  %v1232_v35 = vpack.c.bf16 %v1229_v52, %v1228_v51  ;;  %v1206_v1 = vpop.permute.xlu0 %1205 }
 0x27c   : > { %1831 = vmatprep.subr.bf16.mxu0 %v2421_v36 }
 0x27f   : > { %1832 = vmatpush3.bf16.msra.mxu0 %v2421_v36 }
 0x341   : > { %v1801_v7 = vpop.f32.mrb[4].mxu0 }
 0x342   : > { %v902_v8 = vadd.f32 %v1801_v7, %v2433_v55  ;;  %v893_v21 = vpop.f32.mrb[5].mxu0 }
 0x343   : > { %v894_v22 = vadd.f32 %v2433_v55, %v893_v21  ;;  %v1802_v23 = vpop.f32.mrb[6].mxu0 }
 0x344   : > { %v910_v27 = vmul.f32 %v902_v8, %v902_v8  ;;  %v905_v28 = vadd.f32 %v1802_v23, %v2433_v55  ;;  %v896_v40 = vpop.f32.mrb[7].mxu0  ;;  %v1190_v23 = vpop.permute.xlu1 %1189 }
 0x345   : > { %v908_v41 = vmul.f32 %v894_v22, %v894_v22  ;;  %v897_v43 = vadd.f32 %v2433_v55, %v896_v40 }
 0x346   : > { %v911_v47 = vmul.f32 %v905_v28, %v905_v28  ;;  %v914_v2 = vadd.f32 %v910_v27, %v902_v8  ;;  %v1195_v8 = vmul.f32 %v2212_v20, %v1190_v23 }
 0x347   : > { %v909_v50 = vmul.f32 %v897_v43, %v897_v43  ;;  %v912_v54 = vadd.f32 %v908_v41, %v894_v22  ;;  %v1194_v22 = vmul.f32 %v2212_v20, %v1185_v34 }
 0x348   : > { %v915_v53 = vadd.f32 %v911_v47, %v905_v28  ;;  %v1210_v5 = vpop.permute.xlu1 %1209 }
 0x349   : > { %v913_v7 = vadd.f32 %v909_v50, %v897_v43 }
 0x34a   : > { %v917_v36 = vpack.c.bf16 %v915_v53, %v914_v2 }
 0x34b   : > { %v916_v21 = vpack.c.bf16 %v913_v7, %v912_v54 }
 0x34d   : > { %1819 = vmatprep.mubr.bf16.mxu1 %v916_v21 }
 0x34e   : > { %1820 = vmatmul.mubr.bf16.vlgmr.msra.gmra.mrb[4].mxu1 %v917_v36  ;;  %v1215_v36 = vmul.f32 %v2207_v19, %v1210_v5 }
 0x34f   : > { %1844 = vmatpush3.bf16.msra.mxu1 %v2095_v0  ;;  %1859 = vmatprep.mubr.bf16.mxu1 %v1232_v35  ;;  %v1214_v0 = vmul.f32 %v2207_v19, %v1206_v1 }
 0x350   : > { %1845 = vmatprep.subr.bf16.mxu1 %v2102_v3  ;;  %v1219_v35 = vadd.f32 %v1215_v36, %v1195_v8 }
 0x353   : > { %1846 = vmatpush3.bf16.msra.mxu1 %v2102_v3  ;;  %v1218_v3 = vadd.f32 %v1214_v0, %v1194_v22 }
 0x354   : > { %1847 = vmatprep.subr.bf16.mxu1 %v2123_v6 }
 0x355   : > { %v1222_v24 = vadd.f32 %v2219_v25, %v1218_v3 }
 0x357   : > { %1848 = vmatpush3.bf16.msra.mxu1 %v2123_v6  ;;  %v1223_v6 = vadd.f32 %v2219_v25, %v1219_v35  ;;  %v1226_v19 = vmul.f32 %v1222_v24, %v1222_v24  ;;  %v2504_v25 = vld [vmem:[%s2621_s10] ss:$0 sm:$0xff] }
 0x358   : > { %1849 = vmatprep.subr.bf16.mxu1 %v2132_v9 }
 0x359   : > { %v1227_v20 = vmul.f32 %v1223_v6, %v1223_v6  ;;  %v1230_v34 = vadd.f32 %v1226_v19, %v1222_v24 }
 0x35b   : > { %1850 = vmatpush3.bf16.msra.mxu1 %v2132_v9  ;;  %v1231_v9 = vadd.f32 %v1227_v20, %v1223_v6 }
 0x35c   : > { %1851 = vmatprep.subr.bf16.mxu1 %v2140_v10 }
 0x35f   : > { %1852 = vmatpush3.bf16.msra.mxu1 %v2140_v10  ;;  %v1233_v10 = vpack.c.bf16 %v1231_v9, %v1230_v34 }
 0x360   : > { %1853 = vmatprep.subr.bf16.mxu1 %v2148_v11 }
 0x363   : > { %1854 = vmatpush3.bf16.msra.mxu1 %v2148_v11  ;;  %v2482_v11 = vld [vmem:[%s2622_s11 + $0x28] sm:$0xff]  }
 0x364   : > { %1855 = vmatprep.subr.bf16.mxu1 %v2156_v12  ;;  %1833 = vmatprep.subr.bf16.mxu0 %v2482_v11 }
 0x365   : > { %1834 = vmatpush3.bf16.msra.mxu0 %v2482_v11 }
 0x367   : > { %1856 = vmatpush3.bf16.msra.mxu1 %v2156_v12  ;;  %v2489_v12 = vld [vmem:[%s2622_s11 + $0x30] sm:$0xff]  }
 0x368   : > { %1857 = vmatprep.subr.bf16.mxu1 %v2165_v13  ;;  %1835 = vmatprep.subr.bf16.mxu0 %v2489_v12 }
 0x369   : > { %1836 = vmatpush3.bf16.msra.mxu0 %v2489_v12 }
 0x36b   : > { %1858 = vmatpush3.bf16.msra.mxu1 %v2165_v13  ;;  %v2496_v13 = vld [vmem:[%s2622_s11 + $0x38] sm:$0xff]  }
 0x36c   : > { %1883 = vmatprep.subr.bf16.mxu1 %v2255_v59  ;;  %1837 = vmatprep.subr.bf16.mxu0 %v2496_v13 }
 0x36d   : > { %1838 = vmatpush3.bf16.msra.mxu0 %v2496_v13 }
 0x36e   : > { %1860 = vmatmul.mubr.bf16.vlgmr.msra.gmra.mrb[8].mxu1 %v1233_v10  ;;  %1863 = vmatprep.subr.bf16.mxu0 %v2172_v14 }
 0x36f   : > { %1884 = vmatpush3.bf16.msra.mxu1 %v2255_v59 }
 0x370   : > { %1885 = vmatprep.subr.bf16.mxu1 %v2260_v60 }
 0x373   : > { %1886 = vmatpush3.bf16.msra.mxu1 %v2260_v60 }
 0x374   : > { %1887 = vmatprep.subr.bf16.mxu1 %v2268_v61 }
 0x377   : > { %1888 = vmatpush3.bf16.msra.mxu1 %v2268_v61 }
 0x378   : > { %1889 = vmatprep.subr.bf16.mxu1 %v2275_v62 }
 0x37b   : > { %1890 = vmatpush3.bf16.msra.mxu1 %v2275_v62 }
 0x37c   : > { %1891 = vmatprep.subr.bf16.mxu1 %v2282_v63 }
 0x37f   : > { %1892 = vmatpush3.bf16.msra.mxu1 %v2282_v63 }
 0x380   : > { %1893 = vmatprep.subr.bf16.mxu1 %v2299_v37 }
 0x383   : > { %1894 = vmatpush3.bf16.msra.mxu1 %v2299_v37 }
 0x384   : > { %1895 = vmatprep.subr.bf16.mxu1 %v2306_v38 }
 0x387   : > { %1896 = vmatpush3.bf16.msra.mxu1 %v2306_v38 }
 0x388   : > { %1897 = vmatprep.subr.bf16.mxu1 %v2313_v39 }
 0x38b   : > { %1898 = vmatpush3.bf16.msra.mxu1 %v2313_v39 }
 0x38c   : > { %1923 = vmatprep.subr.bf16.mxu1 %v2394_v32 }
 0x421   : > { %v1821_v59 = vpop.f32.mrb[4].mxu1 }
 0x422   : > { %v1032_v60 = vadd.f32 %v1821_v59, %v2504_v25  ;;  %v1023_v61 = vpop.f32.mrb[5].mxu1 }
 0x423   : > { %v1024_v62 = vadd.f32 %v2504_v25, %v1023_v61  ;;  %v1822_v63 = vpop.f32.mrb[6].mxu1 }
 0x424   : > { %v1040_v37 = vmul.f32 %v1032_v60, %v1032_v60  ;;  %v1035_v38 = vadd.f32 %v1822_v63, %v2504_v25  ;;  %v1026_v39 = vpop.f32.mrb[7].mxu1 }
 0x425   : > { %v1038_v26 = vmul.f32 %v1024_v62, %v1024_v62  ;;  %v1027_v27 = vadd.f32 %v2504_v25, %v1026_v39  ;;  %v2634_v39 = vld [vmem:[#allocation2_spill] sm:$0xff] }
 0x426   : > { %v1041_v28 = vmul.f32 %v1035_v38, %v1035_v38  ;;  %v1044_v41 = vadd.f32 %v1040_v37, %v1032_v60 }
 0x427   : > { %v1039_v40 = vmul.f32 %v1027_v27, %v1027_v27  ;;  %v1042_v47 = vadd.f32 %v1038_v26, %v1024_v62  ;;  %v2636_v26 = vld [vmem:[#allocation4_spill] sm:$0xff] }
 0x428   : > { %v1045_v43 = vadd.f32 %v1041_v28, %v1035_v38 }
 0x429   : > { %v1043_v50 = vadd.f32 %v1039_v40, %v1027_v27 }
 0x42a   : > { %v1047_v51 = vpack.c.bf16 %v1045_v43, %v1044_v41 }
 0x42b   : > { %v1046_v52 = vpack.c.bf16 %v1043_v50, %v1042_v47 }
 0x42d   : > { %1839 = vmatprep.mubr.bf16.mxu0 %v1046_v52 }
 0x42e   : > { %1840 = vmatmul.mubr.bf16.vlgmr.msra.gmra.mrb[8].mxu0 %v1047_v51 }
 0x42f   : > { %1864 = vmatpush3.bf16.msra.mxu0 %v2172_v14 }
 0x430   : > { %1865 = vmatprep.subr.bf16.mxu0 %v2177_v15 }
 0x433   : > { %1866 = vmatpush3.bf16.msra.mxu0 %v2177_v15 }
 0x434   : > { %1867 = vmatprep.subr.bf16.mxu0 %v2185_v16 }
 0x437   : > { %1868 = vmatpush3.bf16.msra.mxu0 %v2185_v16 }
 0x438   : > { %1869 = vmatprep.subr.bf16.mxu0 %v2192_v17 }
 0x43b   : > { %1870 = vmatpush3.bf16.msra.mxu0 %v2192_v17 }
 0x43c   : > { %1871 = vmatprep.subr.bf16.mxu0 %v2199_v18 }
 0x43f   : > { %1872 = vmatpush3.bf16.msra.mxu0 %v2199_v18 }
 0x440   : > { %1873 = vmatprep.subr.bf16.mxu0 %v2234_v56 }
 0x441   : > { %v1861_v2 = vpop.f32.mrb[8].mxu1 }
 0x442   : > { %v1277_v14 = vadd.f32 %v1861_v2, %v2290_v4  ;;  %v1268_v53 = vpop.f32.mrb[9].mxu1 }
 0x443   : > { %v1269_v15 = vadd.f32 %v2290_v4, %v1268_v53  ;;  %v1862_v54 = vpop.f32.mrb[10].mxu1  ;;  %1874 = vmatpush3.bf16.msra.mxu0 %v2234_v56 }
 0x444   : > { %v1285_v16 = vmul.f32 %v1277_v14, %v1277_v14  ;;  %v1280_v7 = vadd.f32 %v1862_v54, %v2290_v4  ;;  %v1271_v21 = vpop.f32.mrb[11].mxu1  ;;  %1875 = vmatprep.subr.bf16.mxu0 %v2241_v57 }
 0x445   : > { %v1283_v17 = vmul.f32 %v1269_v15, %v1269_v15  ;;  %v1272_v18 = vadd.f32 %v2290_v4, %v1271_v21 }
 0x446   : > { %v1286_v23 = vmul.f32 %v1280_v7, %v1280_v7  ;;  %v1289_v1 = vadd.f32 %v1285_v16, %v1277_v14 }
 0x447   : > { %v1284_v5 = vmul.f32 %v1272_v18, %v1272_v18  ;;  %1876 = vmatpush3.bf16.msra.mxu0 %v2241_v57  ;;  %v1287_v22 = vadd.f32 %v1283_v17, %v1269_v15  ;;  %v2548_v57 = vld [vmem:[%s2623_s12] ss:$0 sm:$0xff] }
 0x448   : > { %v1290_v8 = vadd.f32 %v1286_v23, %v1280_v7  ;;  %1877 = vmatprep.subr.bf16.mxu0 %v2248_v58 }
 0x449   : > { %v1288_v36 = vadd.f32 %v1284_v5, %v1272_v18 }
 0x44a   : > { %v1292_v56 = vpack.c.bf16 %v1290_v8, %v1289_v1 }
 0x44b   : > { %1878 = vmatpush3.bf16.msra.mxu0 %v2248_v58  ;;  %v1291_v0 = vpack.c.bf16 %v1288_v36, %v1287_v22 }
 0x44c   : > { %1903 = vmatprep.subr.bf16.mxu0 %v2322_v42 }
 0x44d   : > { %1879 = vmatprep.mubr.bf16.mxu0 %v1291_v0 }
 0x44e   : > { %1880 = vmatmul.mubr.bf16.vlgmr.msra.gmra.mrb[12].mxu0 %v1292_v56 }
 0x44f   : > { %1904 = vmatpush3.bf16.msra.mxu0 %v2322_v42 }
 0x450   : > { %1905 = vmatprep.subr.bf16.mxu0 %v2328_v44 }
 0x453   : > { %1906 = vmatpush3.bf16.msra.mxu0 %v2328_v44 }
 0x454   : > { %1907 = vmatprep.subr.bf16.mxu0 %v2336_v45 }
 0x457   : > { %1908 = vmatpush3.bf16.msra.mxu0 %v2336_v45 }
 0x458   : > { %1909 = vmatprep.subr.bf16.mxu0 %v2345_v46 }
 0x45b   : > { %1910 = vmatpush3.bf16.msra.mxu0 %v2345_v46 }
 0x45c   : > { %1911 = vmatprep.subr.bf16.mxu0 %v2353_v48 }
 0x45f   : > { %1912 = vmatpush3.bf16.msra.mxu0 %v2353_v48 }
 0x460   : > { %1913 = vmatprep.subr.bf16.mxu0 %v2372_v29 }
 0x463   : > { %1914 = vmatpush3.bf16.msra.mxu0 %v2372_v29 }
 0x464   : > { %1915 = vmatprep.subr.bf16.mxu0 %v2379_v30 }
 0x467   : > { %1916 = vmatpush3.bf16.msra.mxu0 %v2379_v30 }
 0x468   : > { %1917 = vmatprep.subr.bf16.mxu0 %v2386_v31 }
 0x46b   : > { %1918 = vmatpush3.bf16.msra.mxu0 %v2386_v31 }
 0x501   : > { %v1841_v58 = vpop.f32.mrb[8].mxu0 }
 0x502   : > { %v1162_v4 = vadd.f32 %v1841_v58, %v2548_v57  ;;  %v1153_v42 = vpop.f32.mrb[9].mxu0 }
 0x503   : > { %v1154_v44 = vadd.f32 %v2548_v57, %v1153_v42  ;;  %v1842_v45 = vpop.f32.mrb[10].mxu0 }
 0x504   : > { %1522 = vst.msk [vmem:[%s2555_s19 + $0x10] sm:$0xff] %vm1519_vm0, %v1162_v4  ;;  %v1165_v46 = vadd.f32 %v1842_v45, %v2548_v57  ;;  %v1156_v48 = vpop.f32.mrb[11].mxu0 }
 0x505   : > { %1520 = vst.msk [vmem:[%s2555_s19] sm:$0xff] %vm1519_vm0, %v1154_v44  ;;  %v1157_v29 = vadd.f32 %v2548_v57, %v1156_v48 }
 0x506   : > { %1523 = vst.msk [vmem:[%s2555_s19 + $0x18] sm:$0xff] %vm1519_vm0, %v1165_v46 }
 0x507   : > { %1521 = vst.msk [vmem:[%s2555_s19 + $0x8] sm:$0xff] %vm1519_vm0, %v1157_v29 }
 0x521   : > { %v1881_v30 = vpop.f32.mrb[12].mxu0 }
 0x522   : > { %v1336_v31 = vadd.f32 %v1881_v30, %v2363_v49  ;;  %v1327_v35 = vpop.f32.mrb[13].mxu0 }
 0x523   : > { %v1328_v3 = vadd.f32 %v2363_v49, %v1327_v35  ;;  %v1882_v6 = vpop.f32.mrb[14].mxu0 }
 0x524   : > { %v1344_v24 = vmul.f32 %v1336_v31, %v1336_v31  ;;  %v1339_v20 = vadd.f32 %v1882_v6, %v2363_v49  ;;  %v1330_v19 = vpop.f32.mrb[15].mxu0 }
 0x525   : > { %v1342_v9 = vmul.f32 %v1328_v3, %v1328_v3  ;;  %v1331_v34 = vadd.f32 %v2363_v49, %v1330_v19  ;;  %v2635_v49 = vld [vmem:[#allocation3_spill] sm:$0xff] }
 0x526   : > { %v1345_v10 = vmul.f32 %v1339_v20, %v1339_v20  ;;  %v1348_v60 = vadd.f32 %v1344_v24, %v1336_v31 }
 0x527   : > { %v1343_v59 = vmul.f32 %v1331_v34, %v1331_v34  ;;  %v1346_v62 = vadd.f32 %v1342_v9, %v1328_v3 }
 0x528   : > { %v1349_v61 = vadd.f32 %v1345_v10, %v1339_v20 }
 0x529   : > { %v1347_v63 = vadd.f32 %v1343_v59, %v1331_v34 }
 0x52a   : > { %v1351_v37 = vpack.c.bf16 %v1349_v61, %v1348_v60 }
 0x52b   : > { %v1350_v38 = vpack.c.bf16 %v1347_v63, %v1346_v62 }
 0x52d   : > { %1899 = vmatprep.mubr.bf16.mxu1 %v1350_v38 }
 0x52e   : > { %1900 = vmatmul.mubr.bf16.vlgmr.msra.gmra.mrb[12].mxu1 %v1351_v37 }
 0x52f   : > { %1924 = vmatpush3.bf16.msra.mxu1 %v2394_v32 }
 0x530   : > { %1925 = vmatprep.subr.bf16.mxu1 %v2399_v33 }
 0x533   : > { %1926 = vmatpush3.bf16.msra.mxu1 %v2399_v33 }
 0x534   : > { %1927 = vmatprep.subr.bf16.mxu1 %v2634_v39 }
 0x537   : > { %1928 = vmatpush3.bf16.msra.mxu1 %v2634_v39 }
 0x538   : > { %1929 = vmatprep.subr.bf16.mxu1 %v2635_v49 }
 0x53b   : > { %1930 = vmatpush3.bf16.msra.mxu1 %v2635_v49 }
 0x53c   : > { %1931 = vmatprep.subr.bf16.mxu1 %v2636_v26 }
 0x53f   : > { %1932 = vmatpush3.bf16.msra.mxu1 %v2636_v26 }
 0x540   : > { %1933 = vmatprep.subr.bf16.mxu1 %v2482_v11 }
 0x543   : > { %1934 = vmatpush3.bf16.msra.mxu1 %v2482_v11 }
 0x544   : > { %1935 = vmatprep.subr.bf16.mxu1 %v2489_v12 }
 0x547   : > { %1936 = vmatpush3.bf16.msra.mxu1 %v2489_v12 }
 0x548   : > { %1937 = vmatprep.subr.bf16.mxu1 %v2496_v13 }
 0x54b   : > { %1938 = vmatpush3.bf16.msra.mxu1 %v2496_v13 }
 0x601   : > { %v1901_v32 = vpop.f32.mrb[12].mxu1 }
 0x602   : > { %v1395_v33 = vadd.f32 %v1901_v32, %v2433_v55  ;;  %v1386_v27 = vpop.f32.mrb[13].mxu1 }
 0x603   : > { %v1387_v28 = vadd.f32 %v2433_v55, %v1386_v27  ;;  %v1902_v40 = vpop.f32.mrb[14].mxu1 }
 0x604   : > { %v1403_v41 = vmul.f32 %v1395_v33, %v1395_v33  ;;  %v1398_v43 = vadd.f32 %v1902_v40, %v2433_v55  ;;  %v1389_v47 = vpop.f32.mrb[15].mxu1 }
 0x605   : > { %v1401_v11 = vmul.f32 %v1387_v28, %v1387_v28  ;;  %v1390_v50 = vadd.f32 %v2433_v55, %v1389_v47 }
 0x606   : > { %v1404_v51 = vmul.f32 %v1398_v43, %v1398_v43  ;;  %v1407_v52 = vadd.f32 %v1403_v41, %v1395_v33 }
 0x607   : > { %v1402_v12 = vmul.f32 %v1390_v50, %v1390_v50  ;;  %v1405_v14 = vadd.f32 %v1401_v11, %v1387_v28 }
 0x608   : > { %v1408_v2 = vadd.f32 %v1404_v51, %v1398_v43 }
 0x609   : > { %v1406_v13 = vadd.f32 %v1402_v12, %v1390_v50 }
 0x60a   : > { %v1410_v53 = vpack.c.bf16 %v1408_v2, %v1407_v52 }
 0x60b   : > { %v1409_v15 = vpack.c.bf16 %v1406_v13, %v1405_v14 }
 0x60d   : > { %1919 = vmatprep.mubr.bf16.mxu0 %v1409_v15 }
 0x60e   : > { %1920 = vmatmul.mubr.bf16.vlgmr.msra.gmra.mrb[16].mxu0 %v1410_v53 }
 0x6e1   : > { %v1921_v54 = vpop.f32.mrb[16].mxu0 }
 0x6e2   : > { %v1454_v16 = vadd.f32 %v1921_v54, %v2504_v25  ;;  %v1445_v7 = vpop.f32.mrb[17].mxu0 }
 0x6e3   : > { %v1446_v21 = vadd.f32 %v2504_v25, %v1445_v7  ;;  %v1922_v17 = vpop.f32.mrb[18].mxu0 }
 0x6e4   : > { %v1462_v18 = vmul.f32 %v1454_v16, %v1454_v16  ;;  %v1457_v55 = vadd.f32 %v1922_v17, %v2504_v25  ;;  %v1448_v23 = vpop.f32.mrb[19].mxu0 }
 0x6e5   : > { %v1460_v5 = vmul.f32 %v1446_v21, %v1446_v21  ;;  %v1449_v1 = vadd.f32 %v2504_v25, %v1448_v23 }
 0x6e6   : > { %v1463_v8 = vmul.f32 %v1457_v55, %v1457_v55  ;;  %v1466_v36 = vadd.f32 %v1462_v18, %v1454_v16 }
 0x6e7   : > { %v1461_v22 = vmul.f32 %v1449_v1, %v1449_v1  ;;  %v1464_v0 = vadd.f32 %v1460_v5, %v1446_v21 }
 0x6e8   : > { %v1467_v56 = vadd.f32 %v1463_v8, %v1457_v55 }
 0x6e9   : > { %v1465_v58 = vadd.f32 %v1461_v22, %v1449_v1 }
 0x6ea   : > { %v1469_v4 = vpack.c.bf16 %v1467_v56, %v1466_v36 }
 0x6eb   : > { %v1468_v42 = vpack.c.bf16 %v1465_v58, %v1464_v0 }
 0x6ed   : > { %1939 = vmatprep.mubr.bf16.mxu1 %v1468_v42 }
 0x6ee   : > { %1940 = vmatmul.mubr.bf16.vlgmr.msra.gmra.mrb[16].mxu1 %v1469_v4 }
 0x7c1   : > { %v1941_v44 = vpop.f32.mrb[16].mxu1 }
 0x7c2   : > { %v1513_v45 = vadd.f32 %v1941_v44, %v2548_v57  ;;  %v1504_v46 = vpop.f32.mrb[17].mxu1 }
 0x7c3   : > { %v1505_v25 = vadd.f32 %v2548_v57, %v1504_v46  ;;  %v1942_v48 = vpop.f32.mrb[18].mxu1 }
 0x7c4   : > { %1526 = vst.msk [vmem:[%s2555_s19 + $0x30] sm:$0xff] %vm1519_vm0, %v1513_v45  ;;  %v1516_v29 = vadd.f32 %v1942_v48, %v2548_v57  ;;  %v1507_v30 = vpop.f32.mrb[19].mxu1 }
 0x7c5   : > { %1524 = vst.msk [vmem:[%s2555_s19 + $0x20] sm:$0xff] %vm1519_vm0, %v1505_v25  ;;  %v1508_v31 = vadd.f32 %v2548_v57, %v1507_v30 }
 0x7c6   : > { %1527 = vst.msk [vmem:[%s2555_s19 + $0x38] sm:$0xff] %vm1519_vm0, %v1516_v29 }
 0x7c7   : > { %1525 = vst.msk [vmem:[%s2555_s19 + $0x28] sm:$0xff] %vm1519_vm0, %v1508_v31 }
 0x7c8 PF: > { %s23_s25 = sadd.s32 1, %s2010_s25  }
 0x7c9   : > { %p20_p4 = scmp.ge.s32.totalorder %s23_s25, 4  }
 0x7cb   :  { %22 = sbr.rel (!%p20_p4) target bundleno = 1 (0x1), region = 102 }

</bundles_post_ra>
